<compile_context>
chip_gen: v5e
topology: v5e:2x2
jax: 0.10.0
libtpu: 0.0.40
codegen_flags: <defaults>
</compile_context>

<pallas_src>
import jax
import jax.numpy as jnp
from jax.experimental import pallas as pl
from jax.experimental.pallas import tpu as pltpu

_LANES = 128
_SUBLANES = 8


def _round_up(n, m):
    return ((n + m - 1) // m) * m


def _linear_kernel(x_ref, w_ref, o_ref):
    # (tw, 128) @ (128, 128) -> (tw, 128) on the MXU, f32 accumulation.
    acc = jnp.dot(x_ref[...], w_ref[...], preferred_element_type=jnp.float32)
    o_ref[...] = acc.astype(o_ref.dtype)


def sub_forward(x, weight, *, target_tile_rows=8192):
    """Forward pass of Sub: y = x @ weight.T (no bias).

    x:      (B, 32)  float32
    weight: (32, 32) float32 (PyTorch (out_features, in_features) layout)
    """
    B, in_f = x.shape
    out_f, in_f_w = weight.shape
    assert in_f == in_f_w, (in_f, in_f_w)
    assert _LANES % in_f == 0 and in_f == out_f, (in_f, out_f)

    group = _LANES // in_f  # original rows packed per lane-dense row (=4)

    # Lane-dense weight: W^T repeated on the diagonal of a (128, 128) block.
    # Each packed row [x_i | x_{i+1} | x_{i+2} | x_{i+3}] @ kron(I, W^T)
    # == [x_i W^T | x_{i+1} W^T | x_{i+2} W^T | x_{i+3} W^T].
    w_wide = jnp.kron(jnp.eye(group, dtype=weight.dtype), weight.T)  # (128, 128)

    # Pad B only as far as the lane-dense reshape / sublane alignment needs.
    bw_needed = -(-B // group)                   # ceil(B / group) wide rows
    bw = _round_up(bw_needed, _SUBLANES)         # multiple of 8 sublanes
    pad_rows = bw * group - B
    x_pad = jnp.pad(x, ((0, pad_rows), (0, 0))) if pad_rows else x
    x_wide = x_pad.reshape(bw, _LANES)           # (bw, 128), contiguous view

    # Wide-row tile size: big (amortise per-step overhead) but VMEM-safe.
    tw_target = max(_SUBLANES, _round_up(target_tile_rows // group, _SUBLANES))
    tw = min(tw_target, bw)
    # v7x megacore: if everything landed in one tile but there is >= 2 minimum
    # tiles of work, halve the tile so the parallel grid has >= 2 steps.
    if tw == bw and bw > _SUBLANES:
        tw = _round_up(bw // 2, _SUBLANES)
    grid_len = pl.cdiv(bw, tw)                   # last tile may be partial

    itemsize = x.dtype.itemsize
    cost = pl.CostEstimate(
        flops=2 * B * in_f * out_f,
        transcendentals=0,
        bytes_accessed=(B * in_f + B * out_f + in_f * out_f) * itemsize,
    )

    y_wide = pl.pallas_call(
        _linear_kernel,
        out_shape=jax.ShapeDtypeStruct((bw, _LANES), x.dtype),
        grid_spec=pltpu.PrefetchScalarGridSpec(
            num_scalar_prefetch=0,
            grid=(grid_len,),
            in_specs=[
                pl.BlockSpec((tw, _LANES), lambda i: (i, 0)),      # batch tile of x
                pl.BlockSpec((_LANES, _LANES), lambda i: (0, 0)),  # whole weight, reused
            ],
            out_specs=pl.BlockSpec((tw, _LANES), lambda i: (i, 0)),
        ),
        compiler_params=pltpu.CompilerParams(
            dimension_semantics=("parallel",),  # batch tiles are independent
        ),
        cost_estimate=cost,
    )(x_wide, w_wide)

    # Unpack lane-dense rows back to (B, 32) and drop the padding.
    return y_wide.reshape(bw * group, out_f)[:B, :]


if __name__ == "__main__":
    key = jax.random.PRNGKey(0)
    k_x, k_w, k_xb = jax.random.split(key, 3)

    # Module __init__: Linear(32, 32, bias=False) -> weight (32, 32)
    bound = 1.0 / jnp.sqrt(32.0)
    weight = jax.random.uniform(
        k_w, (32, 32), dtype=jnp.float32, minval=-bound, maxval=bound
    )

    # example_inputs(): x of shape (1, 32) -- single padded tile path.
    x = jax.random.normal(k_x, (1, 32), dtype=jnp.float32)
    y = sub_forward(x, weight)
    jax.block_until_ready(y)
    assert y.shape == (1, 32)
    assert jnp.allclose(y, x @ weight.T, atol=1e-5, rtol=1e-5)

    # Ragged multi-tile batch: exercises padding + a >1-step parallel grid.
    xb = jax.random.normal(k_xb, (100, 32), dtype=jnp.float32)
    yb = sub_forward(xb, weight, target_tile_rows=64)
    jax.block_until_ready(yb)
    assert yb.shape == (100, 32)
    assert jnp.allclose(yb, xb @ weight.T, atol=1e-5, rtol=1e-5)

    print("KERNEL_OK")
</pallas_src>

<mosaic_0001>
module attributes {stable_mosaic.version = 11 : i64} {
  func.func @_linear_kernel(%arg0: i32, %arg1: memref<8x128xf32, #tpu.memory_space<vmem>>, %arg2: memref<128x128xf32, #tpu.memory_space<vmem>>, %arg3: memref<8x128xf32, #tpu.memory_space<vmem>>) attributes {dimension_semantics = [#tpu.dimension_semantics<parallel>], iteration_bounds = array<i64: 1>, scalar_prefetch = 0 : i64, scratch_operands = 0 : i64, tpu.core_type = #tpu.core_type<tc>, window_params = [{transform_indices = @transform_0, window_bounds = array<i64: 8, 128>}, {pipeline_mode = #tpu.pipeline_mode<synchronous>, transform_indices = @transform_1, window_bounds = array<i64: 128, 128>}, {transform_indices = @transform_2, window_bounds = array<i64: 8, 128>}]} {
    %c0 = arith.constant 0 : index
    %c0_0 = arith.constant 0 : index
    %0 = vector.load %arg1[%c0, %c0_0] : memref<8x128xf32, #tpu.memory_space<vmem>>, vector<8x128xf32>
    %c0_1 = arith.constant 0 : index
    %c0_2 = arith.constant 0 : index
    %1 = vector.load %arg2[%c0_1, %c0_2] : memref<128x128xf32, #tpu.memory_space<vmem>>, vector<128x128xf32>
    %cst = arith.constant dense<0.000000e+00> : vector<8x128xf32>
    %2 = tpu.matmul %0, %1, %cst {dimension_numbers = #tpu.dot_dimension_numbers<[1], [0], [0], [1], [0, 0, 1, 1], [], []>} : vector<8x128xf32>, vector<128x128xf32>, vector<8x128xf32> -> vector<8x128xf32>
    %c0_3 = arith.constant 0 : index
    %c0_4 = arith.constant 0 : index
    %3 = vector.load %arg3[%c0_3, %c0_4] : memref<8x128xf32, #tpu.memory_space<vmem>>, vector<8x128xf32>
    tpu.vector_store %arg3[%c0_3, %c0_4], %2 {strides = array<i32>} : memref<8x128xf32, #tpu.memory_space<vmem>>, vector<8x128xf32>,
    return
  }
  func.func @transform_0(%arg0: i32) -> (i32, i32) {
    %c0_i32 = arith.constant 0 : i32
    %c0_i32_0 = arith.constant 0 : i32
    return %arg0, %c0_i32 : i32, i32
  }
  func.func @transform_1(%arg0: i32) -> (i32, i32) {
    %c0_i32 = arith.constant 0 : i32
    %c0_i32_0 = arith.constant 0 : i32
    %c0_i32_1 = arith.constant 0 : i32
    return %c0_i32, %c0_i32_0 : i32, i32
  }
  func.func @transform_2(%arg0: i32) -> (i32, i32) {
    %c0_i32 = arith.constant 0 : i32
    %c0_i32_0 = arith.constant 0 : i32
    return %arg0, %c0_i32 : i32, i32
  }
}

</mosaic_0001>

<bundles_post_ra>
// kernel: tpu_custom_call.1
= control target key start
LH: loop header
LB: loop body
LE: loop exit
PB: predicated region body
PF: predicated region fallthrough
CT: control target
= control target key end

     0   :  { %7 = vsyncpa [#allocation3], 0  ;;  %s210_s0 = inlined_call_operand.hbm [shape: f32[8,128], index: 0, kind: input, shape index: {}]   ;;  %s211_s1 = inlined_call_operand.hbm [shape: f32[128,128], index: 1, kind: input, shape index: {}]   ;;  %s212_s2 = inlined_call_operand.hbm [shape: f32[8,128], index: 2, kind: output, shape index: {}]  }
   0x1   :  { %8 = vsyncpa [#allocation6], 0 }
   0x2   :  { %9 = vsyncpa [#allocation4], 0  ;;  %s15_s11 = sshll.u32 %s210_s0, 4  ;;  %s181_s12 = smov [#allocation2]   ;;  %s16_s11 = int_to_ptr.hbm [resolvable:$true] %s15_s11 }
   0x3   :  { %s17_s13 = sshll.u32 %s181_s12, 4  ;;  %s25_s16 = sshll.u32 %s211_s1, 4  ;;  %s18_s13 = int_to_ptr.vmem [resolvable:$true] %s17_s13  ;;  %s26_s16 = int_to_ptr.hbm [resolvable:$true] %s25_s16 }
   0x4   :  { %20 = dma.hbm_to_vmem [thread:$0]  %s16_s11, 128, %s18_s13, [#allocation3]  }
   0x5   :  { %s182_s17 = smov [#allocation5]   ;;  %s183_s19 = smov 128  }
   0x6   :  { %s27_s18 = sshll.u32 %s182_s17, 4  ;;  %s184_s20 = smov 8   ;;  %s28_s18 = int_to_ptr.vmem [resolvable:$true] %s27_s18 }
   0x7   :  { %33 = dma.hbm_to_vmem [thread:$0]  %s26_s16, 2048, %s28_s18, [#allocation6], %s183_s19, %s183_s19, %s184_s20  }
   0x8   :  { %175 = dma.done.wait [#allocation3], 128  }
   0x9   :  { %176 = vsyncadd [#allocation3], 4294967168 }
   0xa   :  { %177 = dma.done.wait [#allocation6], 2048  }
   0xb   :  { %178 = vsyncadd [#allocation6], 4294965248  ;;  %v58_v0 = vld [vmem:[#allocation5 + $0x78] sm:$0xff]  ;;  %v57_v1 = vld [vmem:[#allocation5 + $0x70] sm:$0xff]  ;;  %s185_s0 = smov [#allocation7]   ;;  %s87_s23 = sshll.u32 %s212_s2, 4  ;;  %s88_s23 = int_to_ptr.hbm [resolvable:$true] %s87_s23 }
   0xc   :  { %59 = vmatpush.msra.mxu0 %v58_v0  ;;  %v56_v2 = vld [vmem:[#allocation5 + $0x68] sm:$0xff]  ;;  %v55_v3 = vld [vmem:[#allocation5 + $0x60] sm:$0xff]  ;;  %v54_v4 = vld [vmem:[#allocation5 + $0x58] sm:$0xff]  ;;  %s85_s1 = sshll.u32 %s185_s0, 4  ;;  %s86_s1 = int_to_ptr.vmem [resolvable:$true] %s85_s1 }
   0xd   :  { %v53_v5 = vld [vmem:[#allocation5 + $0x50] sm:$0xff]  ;;  %v52_v6 = vld [vmem:[#allocation5 + $0x48] sm:$0xff]  ;;  %v51_v7 = vld [vmem:[#allocation5 + $0x40] sm:$0xff] }
   0xe   :  { %60 = vmatpush.msra.mxu0 %v57_v1  ;;  %v50_v8 = vld [vmem:[#allocation5 + $0x38] sm:$0xff]  ;;  %v49_v9 = vld [vmem:[#allocation5 + $0x30] sm:$0xff]  ;;  %v48_v10 = vld [vmem:[#allocation5 + $0x28] sm:$0xff] }
   0xf   :  { %v47_v11 = vld [vmem:[#allocation5 + $0x20] sm:$0xff]  ;;  %v46_v12 = vld [vmem:[#allocation5 + $0x18] sm:$0xff]  ;;  %v45_v13 = vld [vmem:[#allocation5 + $0x10] sm:$0xff] }
  0x10   :  { %61 = vmatpush.msra.mxu0 %v56_v2  ;;  %v44_v14 = vld [vmem:[#allocation5 + $0x8] sm:$0xff]  ;;  %v43_v15 = vld [vmem:[#allocation5] sm:$0xff]  ;;  %v42_v16 = vld [vmem:[#allocation2] sm:$0xff] }
  0x12   :  { %62 = vmatpush.msra.mxu0 %v55_v3 }
  0x14   :  { %63 = vmatpush.msra.mxu0 %v54_v4 }
  0x16   :  { %64 = vmatpush.msra.mxu0 %v53_v5 }
  0x18   :  { %65 = vmatpush.msra.mxu0 %v52_v6 }
  0x1a   :  { %66 = vmatpush.msra.mxu0 %v51_v7 }
  0x1c   :  { %67 = vmatpush.msra.mxu0 %v50_v8 }
  0x1e   :  { %68 = vmatpush.msra.mxu0 %v49_v9 }
  0x20   :  { %69 = vmatpush.msra.mxu0 %v48_v10 }
  0x22   :  { %70 = vmatpush.msra.mxu0 %v47_v11 }
  0x24   :  { %71 = vmatpush.msra.mxu0 %v46_v12 }
  0x26   :  { %72 = vmatpush.msra.mxu0 %v45_v13 }
  0x28   :  { %73 = vmatpush.msra.mxu0 %v44_v14 }
  0x2a   :  { %74 = vmatpush.msra.mxu0 %v43_v15 }
  0x2b   :  { %75 = vmatmul.f32.vlgmr.msra.gmra.mxu0 %v42_v16 }
  0xa8   :  { %v76_v17 = vpop.f32.mrf.mxu0 }
  0xa9   :  { %79 = vst [vmem:[#allocation7] sm:$0xff] %v76_v17 }
  0xaa   :  { %90 = dma.vmem_to_hbm [thread:$0]  %s86_s1, 128, %s88_s23, [#allocation4]  }
  0xab   :  { %179 = dma.done.wait [#allocation4], 128  }
  0xac   :  { %180 = vsyncadd [#allocation4], 4294967168 }
  0xad   :  { %95 = vsyncpa [#allocation3], 1 }
  0xae   :  { %96 = vsyncpa [#allocation6], 1 }
  0xaf   :  { %97 = vsyncpa [#allocation4], 1 }

</bundles_post_ra>
